<compile_context>
chip_gen: v6e
topology: v6e:2x2x1
jax: 0.10.0
libtpu: 0.0.40
codegen_flags: <defaults>
</compile_context>

<pallas_src>
import functools

import jax
import jax.numpy as jnp
import numpy as np
from jax.experimental import pallas as pl
from jax.experimental.pallas import tpu as pltpu


def _res2_kernel(x_ref, w_ref, cb_ref, bns_ref, bnb_ref, o_ref, *, scale, width):
    """One (1, C, tT) block of x in native (B, C, T) layout.

    x_ref   : (1, C, tT)           channels on sublanes, time on lanes
    w_ref   : (nums, width, width) conv weights [out_ch, in_ch] (k=1 squeezed)
    cb_ref  : (nums, width, 1)     conv bias columns
    bns_ref : (nums, width, 1)     folded BN scale columns
    bnb_ref : (nums, width, 1)     folded BN shift columns
    o_ref   : (1, C, tT)
    """
    nums = scale if scale == 1 else scale - 1

    sp = x_ref[0, 0:width, :]                                 # (width, tT)
    for i in range(nums):
        if i > 0:
            sp = sp + x_ref[0, i * width:(i + 1) * width, :]  # res2 chaining
        y = jnp.dot(w_ref[i], sp, preferred_element_type=jnp.float32)
        y = y + cb_ref[i]                                     # conv bias   (width,1) bcast
        y = jnp.maximum(y, 0.0)                               # ReLU
        y = y * bns_ref[i] + bnb_ref[i]                       # inference BatchNorm
        # Incremental sublane-slice store (lane-dense along T).
        o_ref[0, i * width:(i + 1) * width, :] = y.astype(o_ref.dtype)
        sp = y
    if scale != 1:
        # Pass-through last chunk.
        o_ref[0, nums * width:scale * width, :] = x_ref[0, nums * width:scale * width, :]


def _vmem_limit_bytes():
    """Per-generation scoped-VMEM cap: <=48 MiB on v7x (64 MiB/TC), 64 MiB otherwise."""
    cap = None
    try:
        cap = pltpu.get_tpu_info().vmem_capacity_bytes
    except Exception:
        cap = None
    if cap is not None and cap <= 64 * 1024 * 1024:
        return 48 * 1024 * 1024
    return 64 * 1024 * 1024


def res2conv1d_relu_bn(x, conv_w, conv_b, bn_gamma, bn_beta, bn_mean, bn_var,
                       *, scale, eps=1e-5, max_tile_t=None):
    """x: (B, C, T). conv_w: (nums, width, width) = [out_ch, in_ch] (k=1 squeezed).
    conv_b / bn_*: (nums, width). Returns (B, C, T)."""
    B, C, T = x.shape
    assert C % scale == 0
    width = C // scale
    nums = scale if scale == 1 else scale - 1
    assert conv_w.shape == (nums, width, width)

    f32 = jnp.float32
    # Fold inference BatchNorm into per-channel scale / shift columns.
    inv_std = 1.0 / jnp.sqrt(bn_var.astype(f32) + eps)                    # (nums, width)
    bn_scale = (bn_gamma.astype(f32) * inv_std)[:, :, None]               # (nums, width, 1)
    bn_shift = (bn_beta.astype(f32)
                - bn_mean.astype(f32) * bn_gamma.astype(f32) * inv_std)[:, :, None]
    cb = conv_b.astype(f32)[:, :, None]                                   # (nums, width, 1)
    wc = conv_w.astype(f32)                                               # (nums, out, in): y = W @ sp

    vmem_limit = _vmem_limit_bytes()
    if max_tile_t is None:
        # Budget: double-buffered x + out tiles of (C, tT) f32 inside ~60% of the cap.
        budget = int(vmem_limit * 0.6)
        max_tile_t = (budget // (16 * C) // 128) * 128
        max_tile_t = int(min(max(max_tile_t, 128), 2048))
    if T <= max_tile_t:
        tT = T                                   # single full-extent T block
    else:
        tT = max(128, (max_tile_t // 128) * 128)  # lane-aligned tile; last block masked
    nT = pl.cdiv(T, tT)

    kernel = functools.partial(_res2_kernel, scale=scale, width=width)
    out = pl.pallas_call(
        kernel,
        out_shape=jax.ShapeDtypeStruct((B, C, T), x.dtype),
        grid=(B, nT),
        in_specs=[
            pl.BlockSpec((1, C, tT), lambda b, t: (b, 0, t)),                 # streamed x tile
            pl.BlockSpec((nums, width, width), lambda b, t: (0, 0, 0)),       # resident weights
            pl.BlockSpec((nums, width, 1), lambda b, t: (0, 0, 0)),           # resident bias
            pl.BlockSpec((nums, width, 1), lambda b, t: (0, 0, 0)),           # resident BN scale
            pl.BlockSpec((nums, width, 1), lambda b, t: (0, 0, 0)),           # resident BN shift
        ],
        out_specs=pl.BlockSpec((1, C, tT), lambda b, t: (b, 0, t)),
        compiler_params=pltpu.CompilerParams(
            dimension_semantics=("parallel", "parallel"),
            vmem_limit_bytes=vmem_limit,
        ),
    )(x, wc, cb, bn_scale, bn_shift)
    return out


def res2conv1d_relu_bn_ref(x, conv_w, conv_b, bn_gamma, bn_beta, bn_mean, bn_var,
                           *, scale, eps=1e-5):
    """Pure-JAX faithful translation of the PyTorch forward (inference BN)."""
    B, C, T = x.shape
    width = C // scale
    nums = scale if scale == 1 else scale - 1
    spx = [x[:, i * width:(i + 1) * width, :] for i in range(scale)]
    outs = []
    sp = None
    for i in range(nums):
        sp = spx[i] if i == 0 else sp + spx[i]
        y = jnp.einsum('oc,bct->bot', conv_w[i], sp) + conv_b[i][None, :, None]
        y = jnp.maximum(y, 0.0)
        y = ((y - bn_mean[i][None, :, None])
             / jnp.sqrt(bn_var[i][None, :, None] + eps)
             * bn_gamma[i][None, :, None] + bn_beta[i][None, :, None])
        outs.append(y)
        sp = y
    if scale != 1:
        outs.append(spx[scale - 1])
    return jnp.concatenate(outs, axis=1)


if __name__ == "__main__":
    # Shapes consistent with the module: x is (B, channels, T), scale=4.
    B, C, scale = 2, 32, 4
    width = C // scale       # 8
    nums = scale - 1         # 3

    key = jax.random.PRNGKey(0)
    kx, kw, kb, kg, kbe, km, kv = jax.random.split(key, 7)
    conv_w = jax.random.normal(kw, (nums, width, width), dtype=jnp.float32) * 0.2
    conv_b = jax.random.normal(kb, (nums, width), dtype=jnp.float32) * 0.1
    bn_gamma = 1.0 + 0.1 * jax.random.normal(kg, (nums, width), dtype=jnp.float32)
    bn_beta = 0.1 * jax.random.normal(kbe, (nums, width), dtype=jnp.float32)
    bn_mean = 0.1 * jax.random.normal(km, (nums, width), dtype=jnp.float32)
    bn_var = jnp.abs(jax.random.normal(kv, (nums, width), dtype=jnp.float32)) + 0.5

    # Case 1: T=100 -> single full-extent T block (no padding, no transpose).
    # Case 2: T=300 with forced 128-lane tiles -> multi-step grid + ragged last tile.
    for T, max_tile_t in ((100, None), (300, 128)):
        x = jax.random.normal(jax.random.fold_in(kx, T), (B, C, T), dtype=jnp.float32)
        out = res2conv1d_relu_bn(x, conv_w, conv_b, bn_gamma, bn_beta, bn_mean, bn_var,
                                 scale=scale, max_tile_t=max_tile_t)
        out = jax.block_until_ready(out)
        ref = res2conv1d_relu_bn_ref(x, conv_w, conv_b, bn_gamma, bn_beta, bn_mean, bn_var,
                                     scale=scale)
        assert out.shape == (B, C, T)
        np.testing.assert_allclose(np.asarray(out), np.asarray(ref), atol=1e-4, rtol=1e-4)

    print("KERNEL_OK")
</pallas_src>

<mosaic_0001>
module attributes {stable_mosaic.version = 11 : i64} {
  func.func @_res2_kernel(%arg0: i32, %arg1: i32, %arg2: memref<1x32x100xf32, #tpu.memory_space<vmem>>, %arg3: memref<3x8x8xf32, #tpu.memory_space<vmem>>, %arg4: memref<3x8x1xf32, #tpu.memory_space<vmem>>, %arg5: memref<3x8x1xf32, #tpu.memory_space<vmem>>, %arg6: memref<3x8x1xf32, #tpu.memory_space<vmem>>, %arg7: memref<1x32x100xf32, #tpu.memory_space<vmem>>) attributes {dimension_semantics = [#tpu.dimension_semantics<parallel>, #tpu.dimension_semantics<parallel>], iteration_bounds = array<i64: 2, 1>, scalar_prefetch = 0 : i64, scratch_operands = 0 : i64, tpu.core_type = #tpu.core_type<tc>, window_params = [{transform_indices = @transform_0, window_bounds = array<i64: 1, 32, 100>}, {pipeline_mode = #tpu.pipeline_mode<synchronous>, transform_indices = @transform_1, window_bounds = array<i64: 3, 8, 8>}, {pipeline_mode = #tpu.pipeline_mode<synchronous>, transform_indices = @transform_2, window_bounds = array<i64: 3, 8, 1>}, {pipeline_mode = #tpu.pipeline_mode<synchronous>, transform_indices = @transform_3, window_bounds = array<i64: 3, 8, 1>}, {pipeline_mode = #tpu.pipeline_mode<synchronous>, transform_indices = @transform_4, window_bounds = array<i64: 3, 8, 1>}, {transform_indices = @transform_5, window_bounds = array<i64: 1, 32, 100>}]} {
    %c0 = arith.constant 0 : index
    %c0_0 = arith.constant 0 : index
    %c0_1 = arith.constant 0 : index
    %0 = vector.load %arg2[%c0, %c0_0, %c0_1] : memref<1x32x100xf32, #tpu.memory_space<vmem>>, vector<1x8x100xf32>
    %1 = vector.shape_cast %0 : vector<1x8x100xf32> to vector<8x100xf32>
    %c0_2 = arith.constant 0 : index
    %c0_3 = arith.constant 0 : index
    %c0_4 = arith.constant 0 : index
    %2 = vector.load %arg3[%c0_2, %c0_3, %c0_4] : memref<3x8x8xf32, #tpu.memory_space<vmem>>, vector<1x8x8xf32>
    %3 = vector.shape_cast %2 : vector<1x8x8xf32> to vector<8x8xf32>
    %cst = arith.constant dense<0.000000e+00> : vector<8x100xf32>
    %4 = tpu.matmul %3, %1, %cst {dimension_numbers = #tpu.dot_dimension_numbers<[1], [0], [0], [1], [0, 0, 1, 1], [], []>} : vector<8x8xf32>, vector<8x100xf32>, vector<8x100xf32> -> vector<8x100xf32>
    %c0_5 = arith.constant 0 : index
    %c0_6 = arith.constant 0 : index
    %c0_7 = arith.constant 0 : index
    %5 = vector.load %arg4[%c0_5, %c0_6, %c0_7] : memref<3x8x1xf32, #tpu.memory_space<vmem>>, vector<1x8x1xf32>
    %6 = vector.shape_cast %5 : vector<1x8x1xf32> to vector<8x1xf32>
    %7 = vector.broadcast %6 : vector<8x1xf32> to vector<8x100xf32>
    %8 = arith.addf %4, %7 : vector<8x100xf32>
    %cst_8 = arith.constant 0.000000e+00 : f32
    %9 = vector.broadcast %cst_8 : f32 to vector<8x100xf32>
    %10 = arith.maximumf %8, %9 : vector<8x100xf32>
    %c0_9 = arith.constant 0 : index
    %c0_10 = arith.constant 0 : index
    %c0_11 = arith.constant 0 : index
    %11 = vector.load %arg5[%c0_9, %c0_10, %c0_11] : memref<3x8x1xf32, #tpu.memory_space<vmem>>, vector<1x8x1xf32>
    %12 = vector.shape_cast %11 : vector<1x8x1xf32> to vector<8x1xf32>
    %13 = vector.broadcast %12 : vector<8x1xf32> to vector<8x100xf32>
    %14 = arith.mulf %10, %13 : vector<8x100xf32>
    %c0_12 = arith.constant 0 : index
    %c0_13 = arith.constant 0 : index
    %c0_14 = arith.constant 0 : index
    %15 = vector.load %arg6[%c0_12, %c0_13, %c0_14] : memref<3x8x1xf32, #tpu.memory_space<vmem>>, vector<1x8x1xf32>
    %16 = vector.shape_cast %15 : vector<1x8x1xf32> to vector<8x1xf32>
    %17 = vector.broadcast %16 : vector<8x1xf32> to vector<8x100xf32>
    %18 = arith.addf %14, %17 : vector<8x100xf32>
    %c0_15 = arith.constant 0 : index
    %c0_16 = arith.constant 0 : index
    %c0_17 = arith.constant 0 : index
    %19 = vector.load %arg7[%c0_15, %c0_16, %c0_17] : memref<1x32x100xf32, #tpu.memory_space<vmem>>, vector<1x8x100xf32>
    %20 = vector.shape_cast %19 : vector<1x8x100xf32> to vector<8x100xf32>
    %21 = vector.shape_cast %18 : vector<8x100xf32> to vector<1x8x100xf32>
    tpu.vector_store %arg7[%c0_15, %c0_16, %c0_17], %21 {strides = array<i32>} : memref<1x32x100xf32, #tpu.memory_space<vmem>>, vector<1x8x100xf32>,
    %c0_18 = arith.constant 0 : index
    %c8 = arith.constant 8 : index
    %c0_19 = arith.constant 0 : index
    %22 = vector.load %arg2[%c0_18, %c8, %c0_19] : memref<1x32x100xf32, #tpu.memory_space<vmem>>, vector<1x8x100xf32>
    %23 = vector.shape_cast %22 : vector<1x8x100xf32> to vector<8x100xf32>
    %24 = arith.addf %18, %23 : vector<8x100xf32>
    %c1 = arith.constant 1 : index
    %c0_20 = arith.constant 0 : index
    %c0_21 = arith.constant 0 : index
    %25 = vector.load %arg3[%c1, %c0_20, %c0_21] : memref<3x8x8xf32, #tpu.memory_space<vmem>>, vector<1x8x8xf32>
    %26 = vector.shape_cast %25 : vector<1x8x8xf32> to vector<8x8xf32>
    %cst_22 = arith.constant dense<0.000000e+00> : vector<8x100xf32>
    %27 = tpu.matmul %26, %24, %cst_22 {dimension_numbers = #tpu.dot_dimension_numbers<[1], [0], [0], [1], [0, 0, 1, 1], [], []>} : vector<8x8xf32>, vector<8x100xf32>, vector<8x100xf32> -> vector<8x100xf32>
    %c1_23 = arith.constant 1 : index
    %c0_24 = arith.constant 0 : index
    %c0_25 = arith.constant 0 : index
    %28 = vector.load %arg4[%c1_23, %c0_24, %c0_25] : memref<3x8x1xf32, #tpu.memory_space<vmem>>, vector<1x8x1xf32>
    %29 = vector.shape_cast %28 : vector<1x8x1xf32> to vector<8x1xf32>
    %30 = vector.broadcast %29 : vector<8x1xf32> to vector<8x100xf32>
    %31 = arith.addf %27, %30 : vector<8x100xf32>
    %cst_26 = arith.constant 0.000000e+00 : f32
    %32 = vector.broadcast %cst_26 : f32 to vector<8x100xf32>
    %33 = arith.maximumf %31, %32 : vector<8x100xf32>
    %c1_27 = arith.constant 1 : index
    %c0_28 = arith.constant 0 : index
    %c0_29 = arith.constant 0 : index
    %34 = vector.load %arg5[%c1_27, %c0_28, %c0_29] : memref<3x8x1xf32, #tpu.memory_space<vmem>>, vector<1x8x1xf32>
    %35 = vector.shape_cast %34 : vector<1x8x1xf32> to vector<8x1xf32>
    %36 = vector.broadcast %35 : vector<8x1xf32> to vector<8x100xf32>
    %37 = arith.mulf %33, %36 : vector<8x100xf32>
    %c1_30 = arith.constant 1 : index
    %c0_31 = arith.constant 0 : index
    %c0_32 = arith.constant 0 : index
    %38 = vector.load %arg6[%c1_30, %c0_31, %c0_32] : memref<3x8x1xf32, #tpu.memory_space<vmem>>, vector<1x8x1xf32>
    %39 = vector.shape_cast %38 : vector<1x8x1xf32> to vector<8x1xf32>
    %40 = vector.broadcast %39 : vector<8x1xf32> to vector<8x100xf32>
    %41 = arith.addf %37, %40 : vector<8x100xf32>
    %c0_33 = arith.constant 0 : index
    %c8_34 = arith.constant 8 : index
    %c0_35 = arith.constant 0 : index
    %42 = vector.load %arg7[%c0_33, %c8_34, %c0_35] : memref<1x32x100xf32, #tpu.memory_space<vmem>>, vector<1x8x100xf32>
    %43 = vector.shape_cast %42 : vector<1x8x100xf32> to vector<8x100xf32>
    %44 = vector.shape_cast %41 : vector<8x100xf32> to vector<1x8x100xf32>
    tpu.vector_store %arg7[%c0_33, %c8_34, %c0_35], %44 {strides = array<i32>} : memref<1x32x100xf32, #tpu.memory_space<vmem>>, vector<1x8x100xf32>,
    %c0_36 = arith.constant 0 : index
    %c16 = arith.constant 16 : index
    %c0_37 = arith.constant 0 : index
    %45 = vector.load %arg2[%c0_36, %c16, %c0_37] : memref<1x32x100xf32, #tpu.memory_space<vmem>>, vector<1x8x100xf32>
    %46 = vector.shape_cast %45 : vector<1x8x100xf32> to vector<8x100xf32>
    %47 = arith.addf %41, %46 : vector<8x100xf32>
    %c2 = arith.constant 2 : index
    %c0_38 = arith.constant 0 : index
    %c0_39 = arith.constant 0 : index
    %48 = vector.load %arg3[%c2, %c0_38, %c0_39] : memref<3x8x8xf32, #tpu.memory_space<vmem>>, vector<1x8x8xf32>
    %49 = vector.shape_cast %48 : vector<1x8x8xf32> to vector<8x8xf32>
    %cst_40 = arith.constant dense<0.000000e+00> : vector<8x100xf32>
    %50 = tpu.matmul %49, %47, %cst_40 {dimension_numbers = #tpu.dot_dimension_numbers<[1], [0], [0], [1], [0, 0, 1, 1], [], []>} : vector<8x8xf32>, vector<8x100xf32>, vector<8x100xf32> -> vector<8x100xf32>
    %c2_41 = arith.constant 2 : index
    %c0_42 = arith.constant 0 : index
    %c0_43 = arith.constant 0 : index
    %51 = vector.load %arg4[%c2_41, %c0_42, %c0_43] : memref<3x8x1xf32, #tpu.memory_space<vmem>>, vector<1x8x1xf32>
    %52 = vector.shape_cast %51 : vector<1x8x1xf32> to vector<8x1xf32>
    %53 = vector.broadcast %52 : vector<8x1xf32> to vector<8x100xf32>
    %54 = arith.addf %50, %53 : vector<8x100xf32>
    %cst_44 = arith.constant 0.000000e+00 : f32
    %55 = vector.broadcast %cst_44 : f32 to vector<8x100xf32>
    %56 = arith.maximumf %54, %55 : vector<8x100xf32>
    %c2_45 = arith.constant 2 : index
    %c0_46 = arith.constant 0 : index
    %c0_47 = arith.constant 0 : index
    %57 = vector.load %arg5[%c2_45, %c0_46, %c0_47] : memref<3x8x1xf32, #tpu.memory_space<vmem>>, vector<1x8x1xf32>
    %58 = vector.shape_cast %57 : vector<1x8x1xf32> to vector<8x1xf32>
    %59 = vector.broadcast %58 : vector<8x1xf32> to vector<8x100xf32>
    %60 = arith.mulf %56, %59 : vector<8x100xf32>
    %c2_48 = arith.constant 2 : index
    %c0_49 = arith.constant 0 : index
    %c0_50 = arith.constant 0 : index
    %61 = vector.load %arg6[%c2_48, %c0_49, %c0_50] : memref<3x8x1xf32, #tpu.memory_space<vmem>>, vector<1x8x1xf32>
    %62 = vector.shape_cast %61 : vector<1x8x1xf32> to vector<8x1xf32>
    %63 = vector.broadcast %62 : vector<8x1xf32> to vector<8x100xf32>
    %64 = arith.addf %60, %63 : vector<8x100xf32>
    %c0_51 = arith.constant 0 : index
    %c16_52 = arith.constant 16 : index
    %c0_53 = arith.constant 0 : index
    %65 = vector.load %arg7[%c0_51, %c16_52, %c0_53] : memref<1x32x100xf32, #tpu.memory_space<vmem>>, vector<1x8x100xf32>
    %66 = vector.shape_cast %65 : vector<1x8x100xf32> to vector<8x100xf32>
    %67 = vector.shape_cast %64 : vector<8x100xf32> to vector<1x8x100xf32>
    tpu.vector_store %arg7[%c0_51, %c16_52, %c0_53], %67 {strides = array<i32>} : memref<1x32x100xf32, #tpu.memory_space<vmem>>, vector<1x8x100xf32>,
    %c0_54 = arith.constant 0 : index
    %c24 = arith.constant 24 : index
    %c0_55 = arith.constant 0 : index
    %68 = vector.load %arg2[%c0_54, %c24, %c0_55] : memref<1x32x100xf32, #tpu.memory_space<vmem>>, vector<1x8x100xf32>
    %69 = vector.shape_cast %68 : vector<1x8x100xf32> to vector<8x100xf32>
    %c0_56 = arith.constant 0 : index
    %c24_57 = arith.constant 24 : index
    %c0_58 = arith.constant 0 : index
    %70 = vector.load %arg7[%c0_56, %c24_57, %c0_58] : memref<1x32x100xf32, #tpu.memory_space<vmem>>, vector<1x8x100xf32>
    %71 = vector.shape_cast %70 : vector<1x8x100xf32> to vector<8x100xf32>
    %72 = vector.shape_cast %69 : vector<8x100xf32> to vector<1x8x100xf32>
    tpu.vector_store %arg7[%c0_56, %c24_57, %c0_58], %72 {strides = array<i32>} : memref<1x32x100xf32, #tpu.memory_space<vmem>>, vector<1x8x100xf32>,
    return
  }
  func.func @transform_0(%arg0: i32, %arg1: i32) -> (i32, i32, i32) {
    %c0_i32 = arith.constant 0 : i32
    %c0_i32_0 = arith.constant 0 : i32
    return %arg0, %c0_i32, %arg1 : i32, i32, i32
  }
  func.func @transform_1(%arg0: i32, %arg1: i32) -> (i32, i32, i32) {
    %c0_i32 = arith.constant 0 : i32
    %c0_i32_0 = arith.constant 0 : i32
    %c0_i32_1 = arith.constant 0 : i32
    %c0_i32_2 = arith.constant 0 : i32
    return %c0_i32, %c0_i32_0, %c0_i32_1 : i32, i32, i32
  }
  func.func @transform_2(%arg0: i32, %arg1: i32) -> (i32, i32, i32) {
    %c0_i32 = arith.constant 0 : i32
    %c0_i32_0 = arith.constant 0 : i32
    %c0_i32_1 = arith.constant 0 : i32
    %c0_i32_2 = arith.constant 0 : i32
    return %c0_i32, %c0_i32_0, %c0_i32_1 : i32, i32, i32
  }
  func.func @transform_3(%arg0: i32, %arg1: i32) -> (i32, i32, i32) {
    %c0_i32 = arith.constant 0 : i32
    %c0_i32_0 = arith.constant 0 : i32
    %c0_i32_1 = arith.constant 0 : i32
    %c0_i32_2 = arith.constant 0 : i32
    return %c0_i32, %c0_i32_0, %c0_i32_1 : i32, i32, i32
  }
  func.func @transform_4(%arg0: i32, %arg1: i32) -> (i32, i32, i32) {
    %c0_i32 = arith.constant 0 : i32
    %c0_i32_0 = arith.constant 0 : i32
    %c0_i32_1 = arith.constant 0 : i32
    %c0_i32_2 = arith.constant 0 : i32
    return %c0_i32, %c0_i32_0, %c0_i32_1 : i32, i32, i32
  }
  func.func @transform_5(%arg0: i32, %arg1: i32) -> (i32, i32, i32) {
    %c0_i32 = arith.constant 0 : i32
    %c0_i32_0 = arith.constant 0 : i32
    return %arg0, %c0_i32, %arg1 : i32, i32, i32
  }
}

</mosaic_0001>

<bundles_post_ra>
// kernel: tpu_custom_call.1
= control target key start
LH: loop header
LB: loop body
LE: loop exit
PB: predicated region body
PF: predicated region fallthrough
CT: control target
= control target key end

     0   :  { %10 = vsyncpa [#allocation3], 0  ;;  %s1131_s0 = inlined_call_operand.vmem [shape: f32[2,32,100], index: 0, kind: input, shape index: {}]   ;;  %s1132_s1 = inlined_call_operand.hbm [shape: f32[3,8,8], index: 1, kind: input, shape index: {}]   ;;  %s1133_s2 = inlined_call_operand.vmem [shape: f32[3,8,1], index: 2, kind: input, shape index: {}]   ;;  %s1134_s3 = inlined_call_operand.vmem [shape: f32[3,8,1], index: 3, kind: input, shape index: {}]   ;;  %s1135_s4 = inlined_call_operand.vmem [shape: f32[3,8,1], index: 4, kind: input, shape index: {}]   ;;  %s1136_s5 = inlined_call_operand.hbm [shape: f32[2,32,100], index: 5, kind: output, shape index: {}]  }
   0x1   :  { %11 = vsyncpa [#allocation4], 0 }
   0x2   :  { %13 = vsyncpa [#allocation4 + $0x1], 0  ;;  %s942_s18 = smov 0   ;;  %s944_s19 = smov 0  }
   0x3   :  { %s946_s20 = smov 0   ;;  %s948_s21 = smov 0  }
   0x4   :  { %s950_s22 = smov 0   ;;  %s952_s23 = smov 0  }
   0x5 LB: > { %s673_s24 = sadd.s32 4294967295, %s901_s23   ;;  %s674_s25 = sadd.s32 4294967294, %s901_s23   ;;  %s901_s23 = sphi %s952_s23, %s19_s23   ;;  %s897_s22 = sphi %s950_s22, %s1145_s22   ;;  %s893_s21 = sphi %s948_s21, %s1144_s21   ;;  %s889_s20 = sphi %s946_s20, %s1143_s20   ;;  %s885_s19 = sphi %s944_s19, %s1142_s19   ;;  %s881_s18 = sphi %s942_s18, %s1141_s18  }
   0x6   : > { %s31_s26 = sadd.s32 1, %s897_s22  ;;  %s152_s27 = sadd.s32 1, %s889_s20 }
   0x7   : > { %p33_p0 = scmp.ge.s32.totalorder %s31_s26, 2  ;;  %p162_p1 = scmp.ne.s32.totalorder %s889_s20, %s885_s19 }
   0x8   : > { %p163_p2 = scmp.eq.s32.totalorder %s673_s24, 1  ;;  %p168_p3 = scmp.ne.s32.totalorder %s885_s19, %s881_s18 }
   0x9   : > { %s1147_s26 = smov (%p33_p0, %s31_s26), 0  ;;  %p169_p5 = scmp.eq.s32.totalorder %s674_s25, 1 }
   0xa   : > { %p982_p4 = por %p163_p2, %p162_p1  ;;  %s147_s29 = ssub.s32 %s897_s22, %s1147_s26 }
   0xb   : > { %p675_p6 = scmp.ge.s32.totalorder %s901_s23, 1  ;;  %p150_p7 = scmp.eq.s32.totalorder %s147_s29, 0 }
   0xc   : > { %p989_p8 = por %p169_p5, %p168_p3  ;;  %p176_p9 = scmp.lt.s32.totalorder %s901_s23, 3 }
   0xd   : > { %s995_s6 = scalar_select %p150_p7, %s889_s20, %s152_s27  }
   0xe   : > { %p997_p10 = pnand %p675_p6, %p176_p9  ;;  %p1001_p11 = scmp.eq.s32.totalorder %s673_s24, 0 }
   0xf   : > { %s903_s9 = smov [#allocation2]  }
  0x10   : > { %p726_p12 = pneg %p997_p10  ;;  %s188_s10 = sshll.u32 %s903_s9, 4  ;;  %s189_s10 = int_to_ptr.vmem [resolvable:$true] %s188_s10 }
  0x11   : > { %s806_s11 = scalar_lea.vmem %s189_s10, 384  ;;  %p814_p5 = scmp.lt.s32.totalorder %s189_s10, %s189_s10 }
  0x12   : > { %p727_p13 = pnand %p1001_p11, %p726_p12  ;;  %p807_p1 = scmp.ne.s32.totalorder %s189_s10, %s806_s11 }
  0x13   : > { %p815_p6 = scmp.lt.s32.totalorder %s806_s11, %s806_s11 }
  0x14   : > { %p797_p0 = pneg %p727_p13 }
  0x15   : > { %p816_p7 = por %p815_p6, %p814_p5 }
  0x16   : > { %p809_p2 = pnand %p807_p1, %p797_p0 }
  0x18   : > { %p810_p3 = pneg %p809_p2 }
  0x1a   : > { %p817_p9 = pnand %p816_p7, %p810_p3 }
  0x1c   : > { %820 = shalt.err (!%p817_p9)
}
  0x1d   : > { %s904_s12 = smov 128   ;;  %s905_s13 = smov 8  }
  0x1e   : > { %729 = dma.hbm_to_vmem [thread:$0]  (!%p727_p13), %s1132_s1, 384, %s189_s10, [#allocation3], %s904_s12, %s904_s12, %s905_s13  }
  0x1f   : > { %224 = sbr.rel (%p997_p10) target bundleno = 668 (0x29c), region = 40 }
  0x24   : > { %872 = dma.done.wait (%p1001_p11), [#allocation3], 384  }
  0x25   : > { %874 = vsyncadd (%p1001_p11), [#allocation3], 4294966912  ;;  %p255_p12 = scmp.lt.s32.totalorder %s893_s21, 1  ;;  %v906_v0 = vmov 0.0   ;;  %s252_s16 = sand.u32 1, %s885_s19   ;;  %vm907_vm0 = vmmov 0  }
  0x26   : > { %705 = vmatprep.subr.mxu0 %v906_v0  ;;  %710 = vmatprep.subr.mxu1 %v906_v0  ;;  %v908_v1 = vmov 0   ;;  %s680_s24 = sshll.u32 %s252_s16, 5  ;;  %vm271_vm1 = vcmask 64512   ;;  %vm360_vm2 = vcmask 818176   ;;  %v264_v4 = vld [vmem:[#allocation2] sm:$0xff]  ;;  %v684_v8 = vld [vmem:[%s1133_s2 + $0x8] sm:$0xff] }
  0x27   : > { %707 = vmatprep.mubr.msk.f32.mxu0 %vm907_vm0, %v906_v0  ;;  %793 = vset.pattern.permute.xlu0 %v908_v1  ;;  %s256_s17 = scalar_select %p255_p12, %s893_s21, 1  ;;  %v265_v5 = vld [vmem:[%s1133_s2] sm:$0xff]  ;;  %v686_v9 = vld [vmem:[%s1134_s3 + $0x8] sm:$0xff]  ;;  %v688_v11 = vld [vmem:[%s1133_s2 + $0x10] sm:$0xff] }
  0x28   : > { %794 = vset.pattern.permute.xlu1 %v908_v1  ;;  %712 = vmatprep.mubr.msk.f32.mxu1 %vm907_vm0, %v906_v0  ;;  %s1032_s8 = scalar_lea.vmem [#allocation5], %s680_s24  ;;  %v353_v6 = vld [vmem:[%s1135_s4] sm:$0xff]  ;;  %v687_v10 = vld [vmem:[%s1135_s4 + $0x8] sm:$0xff]  ;;  %v690_v12 = vld [vmem:[%s1134_s3 + $0x10] sm:$0xff]  ;;  %s698_s15 = sshll.u32 %s893_s21, 9 }
  0x29   : > { %s697_s25 = sshll.u32 %s256_s17, 5  ;;  %268 = vperm.xlu0 %793, %v265_v5   ;;  %v346_v7 = vld [vmem:[%s1134_s3] sm:$0xff]  ;;  %356 = vperm.xlu1 %794, %v353_v6   ;;  %v691_v13 = vld [vmem:[%s1135_s4 + $0x10] sm:$0xff]  ;;  %v365_v25 = vld [vmem:[#allocation2 + $0x8] sm:$0xff]  ;;  %s583_s17 = sshll.u32 %s1032_s8, 4  ;;  %s1080_s17 = int_to_ptr.vmem [resolvable:$true] %s583_s17 }
  0x2a   : > { %s1028_s7 = scalar_lea.vmem %s1131_s0, %s697_s25  ;;  %v467_v37 = vld [vmem:[#allocation2 + $0x10] sm:$0xff]  ;;  %s1078_s25 = scalar_lea.hbm %s1136_s5, %s698_s15 }
  0x2b   : > { %v263_v2 = vld [vmem:[%s1028_s7] sm:$0xff]  ;;  %v566_v3 = vld [vmem:[%s1028_s7 + $0x18] sm:$0xff]  ;;  %v362_v22 = vld [vmem:[%s1028_s7 + $0x8] sm:$0xff]  ;;  %s1086_s27 = scalar_lea.sflag [#allocation4], %s252_s16  ;;  %s821_s21 = scalar_lea.vmem %s1080_s17, 512 }
  0x2c   : > { %706 = vmatpush3.msra.mxu0 %v263_v2  ;;  %567 = vst.msk [vmem:[%s1032_s8 + $0x18] sm:$0xff] %vm360_vm2, %v566_v3  ;;  %v464_v34 = vld [vmem:[%s1028_s7 + $0x10] sm:$0xff]  ;;  %p822_p10 = scmp.ne.s32.totalorder %s1080_s17, %s821_s21  ;;  %s909_s29 = smov [#allocation5]  }
  0x2d   : > { %708 = vmatmul.mubr.msk.f32.vlgmr.msra.gmra.mxu0 %vm271_vm1, %v264_v4  ;;  %715 = vmatprep.subr.mxu0 %v906_v0  ;;  %s825_s9 = sshll.u32 %s909_s29, 4  ;;  %s826_s9 = int_to_ptr.vmem [resolvable:$false] %s825_s9 }
  0x2e   : > { %717 = vmatprep.mubr.msk.f32.mxu0 %vm907_vm0, %v906_v0  ;;  %349 = vperm.xlu0 %793, %v346_v7   ;;  %p823_p11 = pnand %p822_p10, %p982_p4  ;;  %s827_s10 = scalar_lea.vmem %s826_s9, 1024 }
  0x2f   : > { %370 = vperm.xlu1 %794, %v684_v8   ;;  %p828_p0 = scmp.lt.s32.totalorder %s1080_s17, %s826_s9  ;;  %p829_p1 = scmp.lt.s32.totalorder %s827_s10, %s821_s21 }
  0x30   : > { %p824_p13 = pneg %p823_p11 }
  0x31   : > { %p830_p2 = por %p829_p1, %p828_p0 }
  0x32   : > { %451 = vperm.xlu0 %793, %v686_v9  }
  0x33   : > { %459 = vperm.xlu1 %794, %v687_v10   ;;  %p831_p3 = pnand %p830_p2, %p824_p13 }
  0x36   : > { %472 = vperm.xlu0 %793, %v688_v11  }
  0x37   : > { %553 = vperm.xlu1 %794, %v690_v12  }
  0x3a   : > { %561 = vperm.xlu0 %793, %v691_v13  }
  0xa4   : > { %v269_v14 = vpop.permute.xlu0 %268  ;;  %v357_v21 = vpop.permute.xlu1 %356 }
  0xa9   : > { %v350_v19 = vpop.permute.xlu0 %349 }
  0xaa   : > { %v371_v26 = vpop.permute.xlu1 %370 }
  0xad   : > { %v452_v31 = vpop.permute.xlu0 %451 }
  0xae   : > { %v460_v33 = vpop.permute.xlu1 %459 }
  0xb1   : > { %v473_v38 = vpop.permute.xlu0 %472 }
  0xb2   : > { %v554_v43 = vpop.permute.xlu1 %553 }
  0xb5   : > { %v562_v45 = vpop.permute.xlu0 %561 }
  0xed   : > { %v341_v15 = vpop.f32.mrf.mxu0 }
  0xee   : > { %v342_v16 = vadd.f32 %v341_v15, %v269_v14 }
  0xef   : > { %v709_v17 = vpop.f32.mrf.mxu0 }
  0xf0   : > { %v345_v18 = vmax.f32 %v342_v16, 0.0 }
  0xf2   : > { %v352_v20 = vmul.f32 %v350_v19, %v345_v18 }
  0xf4   : > { %v359_v23 = vadd.f32 %v357_v21, %v352_v20 }
  0xf6   : > { %361 = vst.msk [vmem:[%s1032_s8] sm:$0xff] %vm360_vm2, %v359_v23  ;;  %v363_v24 = vadd.f32 %v362_v22, %v359_v23 }
  0xf8   : > { %711 = vmatpush3.msra.mxu1 %v363_v24 }
  0xf9   : > { %713 = vmatmul.mubr.msk.f32.vlgmr.msra.gmra.mxu1 %vm271_vm1, %v365_v25 }
 0x1b9   : > { %v442_v27 = vpop.f32.mrf.mxu1 }
 0x1ba   : > { %v443_v28 = vadd.f32 %v442_v27, %v371_v26 }
 0x1bb   : > { %v714_v29 = vpop.f32.mrf.mxu1 }
 0x1bc   : > { %v446_v30 = vmax.f32 %v443_v28, 0.0 }
 0x1be   : > { %v454_v32 = vmul.f32 %v452_v31, %v446_v30 }
 0x1c0   : > { %v462_v35 = vadd.f32 %v460_v33, %v454_v32 }
 0x1c2   : > { %463 = vst.msk [vmem:[%s1032_s8 + $0x8] sm:$0xff] %vm360_vm2, %v462_v35  ;;  %v465_v36 = vadd.f32 %v464_v34, %v462_v35 }
 0x1c4   : > { %716 = vmatpush3.msra.mxu0 %v465_v36 }
 0x1c5   : > { %718 = vmatmul.mubr.msk.f32.vlgmr.msra.gmra.mxu0 %vm271_vm1, %v467_v37 }
 0x285   : > { %v544_v39 = vpop.f32.mrf.mxu0 }
 0x286   : > { %v545_v40 = vadd.f32 %v544_v39, %v473_v38 }
 0x287   : > { %v719_v41 = vpop.f32.mrf.mxu0 }
 0x288   : > { %v548_v42 = vmax.f32 %v545_v40, 0.0 }
 0x28a   : > { %v556_v44 = vmul.f32 %v554_v43, %v548_v42 }
 0x28c   : > { %v564_v46 = vadd.f32 %v562_v45, %v556_v44 }
 0x28e   : > { %565 = vst.msk [vmem:[%s1032_s8 + $0x10] sm:$0xff] %vm360_vm2, %v564_v46 }
 0x28f   : > { %834 = shalt.err (!%p831_p3)
}
 0x290   : > { %s835_s16 = scalar_lea.hbm %s1078_s25, 512  ;;  %s839_s12 = scalar_lea.hbm %s1136_s5, 1024 }
 0x291   : > { %p836_p5 = scmp.ne.s32.totalorder %s1078_s25, %s835_s16  ;;  %p840_p9 = scmp.lt.s32.totalorder %s1078_s25, %s1136_s5 }
 0x292   : > { %p841_p12 = scmp.lt.s32.totalorder %s839_s12, %s835_s16 }
 0x293   : > { %p837_p6 = pnand %p836_p5, %p982_p4 }
 0x294   : > { %p842_p10 = por %p841_p12, %p840_p9 }
 0x295   : > { %p838_p7 = pneg %p837_p6 }
 0x297   : > { %p843_p11 = pnand %p842_p10, %p838_p7 }
 0x299   : > { %846 = shalt.err (!%p843_p11)
}
 0x29a   : > { %s910_s15 = smov 128   ;;  %s911_s7 = smov 8  }
 0x29b   : > { %724 = dma.vmem_to_hbm [thread:$0]  (%p982_p4), %s1080_s17, 512, %s1078_s25, %s1086_s27, %s910_s15, %s910_s15, %s911_s7  }
 0x29c PF: > { %p736_p13 = scmp.ge.s32.totalorder %s901_s23, 2  ;;  %s598_s24 = sand.u32 1, %s881_s18  }
 0x29d   : > { %s599_s21 = scalar_lea.sflag [#allocation4], %s598_s24 }
 0x29e   : > { %p731_p0 = pnand %p736_p13, %p989_p8 }
 0x2a0   : > { %p732_p1 = pneg %p731_p0 }
 0x2a2   : > { %876 = dma.done.wait (%p732_p1), %s599_s21, 512  }
 0x2a3   : > { %878 = vsyncadd (%p732_p1), %s599_s21, 4294966784  ;;  %s19_s23 = sadd.s32 1, %s901_s23   ;;  %s1141_s18 = smov %s885_s19 }
 0x2a4   : > { %p16_p2 = scmp.ge.s32.totalorder %s19_s23, 4   ;;  %s1142_s19 = smov %s889_s20 }
 0x2a5   : > { %s1143_s20 = smov %s995_s6  ;;  %s1144_s21 = smov %s897_s22 }
 0x2a6   : > { %s1145_s22 = smov %s1147_s26  ;;  %18 = sbr.rel (!%p16_p2) target bundleno = 5 (0x5), region = 88 }
 0x2ab   :  { %604 = vsyncpa [#allocation3], 1 }
 0x2ac   :  { %606 = vsyncpa [#allocation3 + $0x1], 1 }
 0x2ad   :  { %607 = vsyncpa [#allocation4], 1 }
 0x2ae   :  { %609 = vsyncpa [#allocation4 + $0x1], 1 }

</bundles_post_ra>
